<compile_context>
chip_gen: v7x
topology: tpu7x:2x2x1
jax: 0.10.0
libtpu: 0.0.40
codegen_flags: <defaults>
</compile_context>

<pallas_src>
import jax
import jax.numpy as jnp
from jax.experimental import pallas as pl
from jax.experimental.pallas import tpu as pltpu


def _outconv_kernel(x_ref,   # (Cin, TM)   bf16 pixel tile, channels on sublanes
                    w_ref,   # (Cout, Cin) bf16 weight (resident)
                    b_ref,   # (Cout, 1)   f32 bias (resident)
                    o_ref):  # (Cout, TM)  output tile (lane-dense)
    y = jnp.dot(w_ref[...], x_ref[...], preferred_element_type=jnp.float32)
    o_ref[...] = (y + b_ref[...]).astype(o_ref.dtype)


def _cdiv(a, b):
    return (a + b - 1) // b


def _round_up(x, m):
    return ((x + m - 1) // m) * m


def _vmem_capacity_bytes():
    """Per-core VMEM capacity; conservative fallback = v7x's 64 MiB."""
    try:
        return int(pltpu.get_tpu_info().vmem_capacity_bytes)
    except Exception:
        return 64 * 1024 * 1024


def _pick_tile(p_hw, cin, cout, n_batch, *, max_tile, vmem_budget,
               in_bytes, out_bytes, min_grid=2):
    """Balanced, lane-dense (multiple-of-128) pixel tile.

    Budget assumes up to 3 input buffers (deep pipeline) + 2 output buffers.
    """
    bytes_per_col = cin * in_bytes * 3 + cout * out_bytes * 2
    by_budget = max(128, (vmem_budget // max(bytes_per_col, 1)) // 128 * 128)
    tile_cap = max(128, min(max_tile, by_budget))

    num_tiles = _cdiv(p_hw, tile_cap)
    # v7x has 2 TensorCores: make sure there are >= 2 grid shards if possible.
    if n_batch * num_tiles < min_grid and p_hw > 128:
        num_tiles = min_grid

    tile = _round_up(_cdiv(p_hw, num_tiles), 128)
    return max(128, min(tile, tile_cap))


def _build_outconv_call(n_batch, cin, cout, p_hw, tile, out_dtype,
                        vmem_limit, deep_pipeline):
    x_kwargs = {}
    if deep_pipeline and hasattr(pl, "Buffered"):
        # Tiny per-step DMA: 3-deep input pipeline keeps the DMA engine busy.
        x_kwargs["pipeline_mode"] = pl.Buffered(3)

    return pl.pallas_call(
        _outconv_kernel,
        out_shape=jax.ShapeDtypeStruct((n_batch, cout, p_hw), out_dtype),
        grid_spec=pltpu.PrefetchScalarGridSpec(
            num_scalar_prefetch=0,
            grid=(n_batch, _cdiv(p_hw, tile)),
            in_specs=[
                # batch dim squeezed; kernel sees (Cin, TM)
                pl.BlockSpec((None, cin, tile), lambda n, i: (n, 0, i),
                             **x_kwargs),
                pl.BlockSpec((cout, cin), lambda n, i: (0, 0)),
                pl.BlockSpec((cout, 1), lambda n, i: (0, 0)),
            ],
            out_specs=pl.BlockSpec((None, cout, tile), lambda n, i: (n, 0, i)),
        ),
        compiler_params=pltpu.CompilerParams(
            dimension_semantics=("parallel", "parallel"),
            vmem_limit_bytes=vmem_limit,
        ),
    )


def outconv_forward(x, weight, bias, *, stream_dtype=jnp.bfloat16,
                    max_tile=32768):
    """x: (N, Cin, H, W) NCHW.  weight: (Cout, Cin).  bias: (Cout,).

    Returns (N, Cout, H, W) = Conv2d(kernel_size=1)(x), in x.dtype.
    Activations/weights are streamed in `stream_dtype` (default bf16) with
    f32 accumulation on the MXU; pass stream_dtype=None for full-f32 streaming.
    """
    N, Cin, H, W = x.shape
    Cout, Cin_w = weight.shape
    assert Cin_w == Cin, "weight shape must be (Cout, Cin)"
    p_hw = H * W
    out_dtype = x.dtype

    in_dtype = x.dtype if stream_dtype is None else jnp.dtype(stream_dtype)
    in_bytes = jnp.dtype(in_dtype).itemsize
    out_bytes = jnp.dtype(out_dtype).itemsize

    vmem_cap = _vmem_capacity_bytes()
    vmem_limit = int(vmem_cap * 0.55)          # consistent, generation-aware
    tile_budget = int(vmem_limit * 0.6)        # headroom for compiler scratch

    tile = _pick_tile(p_hw, Cin, Cout, N, max_tile=max_tile,
                      vmem_budget=tile_budget, in_bytes=in_bytes,
                      out_bytes=out_bytes)

    # Pure metadata reshape; the bf16 cast is the only extra op (in a full
    # network the producer would emit bf16 / the cast fuses upstream).
    x2 = x.reshape(N, Cin, p_hw)
    if x2.dtype != in_dtype:
        x2 = x2.astype(in_dtype)
    w = weight.astype(in_dtype)                    # (Cout, Cin), tiny
    b = bias.astype(jnp.float32).reshape(Cout, 1)  # (Cout, 1), f32 exact add

    deep_pipeline = (Cin * tile * in_bytes) < (512 << 10)

    out3 = None
    if deep_pipeline:
        try:
            out3 = _build_outconv_call(N, Cin, Cout, p_hw, tile, out_dtype,
                                       vmem_limit, True)(x2, w, b)
        except Exception:
            out3 = None  # fall back to default double buffering
    if out3 is None:
        out3 = _build_outconv_call(N, Cin, Cout, p_hw, tile, out_dtype,
                                   vmem_limit, False)(x2, w, b)

    return out3.reshape(N, Cout, H, W)


def outconv_reference(x, weight, bias, stream_dtype=jnp.bfloat16):
    """Pure-JAX reference of the same 1x1 conv (same streaming dtype)."""
    N, Cin, H, W = x.shape
    Cout = weight.shape[0]
    xs = x if stream_dtype is None else x.astype(stream_dtype)
    ws = weight if stream_dtype is None else weight.astype(stream_dtype)
    y = jnp.einsum("ncp,oc->nop", xs.reshape(N, Cin, H * W), ws,
                   preferred_element_type=jnp.float32)
    y = y + bias.astype(jnp.float32)[None, :, None]
    return y.reshape(N, Cout, H, W).astype(x.dtype)


if __name__ == "__main__":
    key = jax.random.PRNGKey(0)
    kx, kw, kb = jax.random.split(key, 3)

    N, Cin, Cout, H, W = 2, 8, 4, 16, 16
    x = jax.random.normal(kx, (N, Cin, H, W), jnp.float32)
    weight = jax.random.normal(kw, (Cout, Cin), jnp.float32) * 0.1
    bias = jax.random.normal(kb, (Cout,), jnp.float32) * 0.1

    y = jax.block_until_ready(outconv_forward(x, weight, bias))
    assert y.shape == (N, Cout, H, W)
    assert y.dtype == x.dtype

    # Exact-path check: same bf16 streaming as the kernel, f32 accumulation.
    y_ref = outconv_reference(x, weight, bias, stream_dtype=jnp.bfloat16)
    assert jnp.allclose(y, y_ref, atol=1e-4, rtol=1e-4), "mismatch vs bf16 reference"

    # Sanity vs full-f32 math (bounded bf16 streaming error).
    y_f32 = outconv_reference(x, weight, bias, stream_dtype=None)
    assert jnp.allclose(y, y_f32, atol=2e-2, rtol=2e-2), "bf16 streaming error too large"

    print("KERNEL_OK")
</pallas_src>

<mosaic_0001>
module attributes {stable_mosaic.version = 11 : i64} {
  func.func @_outconv_kernel(%arg0: i32, %arg1: i32, %arg2: memref<1x8x256xbf16, #tpu.memory_space<vmem>>, %arg3: memref<4x8xbf16, #tpu.memory_space<vmem>>, %arg4: memref<4x1xf32, #tpu.memory_space<vmem>>, %arg5: memref<1x4x256xf32, #tpu.memory_space<vmem>>) attributes {dimension_semantics = [#tpu.dimension_semantics<parallel>, #tpu.dimension_semantics<parallel>], iteration_bounds = array<i64: 2, 1>, scalar_prefetch = 0 : i64, scratch_operands = 0 : i64, tpu.core_type = #tpu.core_type<tc>, window_params = [{transform_indices = @transform_0, window_bounds = array<i64: 1, 8, 256>}, {pipeline_mode = #tpu.pipeline_mode<synchronous>, transform_indices = @transform_1, window_bounds = array<i64: 4, 8>}, {pipeline_mode = #tpu.pipeline_mode<synchronous>, transform_indices = @transform_2, window_bounds = array<i64: 4, 1>}, {transform_indices = @transform_3, window_bounds = array<i64: 1, 4, 256>}]} {
    %c0 = arith.constant 0 : index
    %c0_0 = arith.constant 0 : index
    %0 = vector.load %arg3[%c0, %c0_0] : memref<4x8xbf16, #tpu.memory_space<vmem>>, vector<4x8xbf16>
    %c0_1 = arith.constant 0 : index
    %c0_2 = arith.constant 0 : index
    %c0_3 = arith.constant 0 : index
    %1 = vector.load %arg2[%c0_1, %c0_2, %c0_3] : memref<1x8x256xbf16, #tpu.memory_space<vmem>>, vector<1x8x256xbf16>
    %2 = vector.shape_cast %1 : vector<1x8x256xbf16> to vector<8x256xbf16>
    %cst = arith.constant dense<0.000000e+00> : vector<4x256xf32>
    %3 = tpu.matmul %0, %2, %cst {dimension_numbers = #tpu.dot_dimension_numbers<[1], [0], [0], [1], [0, 0, 1, 1], [], []>} : vector<4x8xbf16>, vector<8x256xbf16>, vector<4x256xf32> -> vector<4x256xf32>
    %c0_4 = arith.constant 0 : index
    %c0_5 = arith.constant 0 : index
    %4 = vector.load %arg4[%c0_4, %c0_5] : memref<4x1xf32, #tpu.memory_space<vmem>>, vector<4x1xf32>
    %5 = vector.broadcast %4 : vector<4x1xf32> to vector<4x256xf32>
    %6 = arith.addf %3, %5 : vector<4x256xf32>
    %c0_6 = arith.constant 0 : index
    %c0_7 = arith.constant 0 : index
    %c0_8 = arith.constant 0 : index
    %7 = vector.load %arg5[%c0_6, %c0_7, %c0_8] : memref<1x4x256xf32, #tpu.memory_space<vmem>>, vector<1x4x256xf32>
    %8 = vector.shape_cast %7 : vector<1x4x256xf32> to vector<4x256xf32>
    %9 = vector.shape_cast %6 : vector<4x256xf32> to vector<1x4x256xf32>
    tpu.vector_store %arg5[%c0_6, %c0_7, %c0_8], %9 {strides = array<i32>} : memref<1x4x256xf32, #tpu.memory_space<vmem>>, vector<1x4x256xf32>,
    return
  }
  func.func @transform_0(%arg0: i32, %arg1: i32) -> (i32, i32, i32) {
    %c0_i32 = arith.constant 0 : i32
    %c0_i32_0 = arith.constant 0 : i32
    return %arg0, %c0_i32, %arg1 : i32, i32, i32
  }
  func.func @transform_1(%arg0: i32, %arg1: i32) -> (i32, i32) {
    %c0_i32 = arith.constant 0 : i32
    %c0_i32_0 = arith.constant 0 : i32
    %c0_i32_1 = arith.constant 0 : i32
    return %c0_i32, %c0_i32_0 : i32, i32
  }
  func.func @transform_2(%arg0: i32, %arg1: i32) -> (i32, i32) {
    %c0_i32 = arith.constant 0 : i32
    %c0_i32_0 = arith.constant 0 : i32
    %c0_i32_1 = arith.constant 0 : i32
    return %c0_i32, %c0_i32_0 : i32, i32
  }
  func.func @transform_3(%arg0: i32, %arg1: i32) -> (i32, i32, i32) {
    %c0_i32 = arith.constant 0 : i32
    %c0_i32_0 = arith.constant 0 : i32
    return %arg0, %c0_i32, %arg1 : i32, i32, i32
  }
}

</mosaic_0001>

<bundles_post_ra>
// kernel: tpu_custom_call.1
= control target key start
LH: loop header
LB: loop body
LE: loop exit
PB: predicated region body
PF: predicated region fallthrough
CT: control target
= control target key end

     0   :  { %8 = vsyncpa [#allocation3], 0  ;;  %s781_s0 = inlined_call_operand.hbm [shape: bf16[2,8,256], index: 0, kind: input, shape index: {}]   ;;  %s782_s1 = inlined_call_operand.vmem [shape: bf16[4,8], index: 1, kind: input, shape index: {}]   ;;  %s783_s2 = inlined_call_operand.vmem [shape: f32[4,1], index: 2, kind: input, shape index: {}]   ;;  %s784_s3 = inlined_call_operand.hbm [shape: f32[2,4,256], index: 3, kind: output, shape index: {}]  }
   0x1   :  { %10 = vsyncpa [#allocation3 + $0x1], 0 }
   0x2   :  { %11 = vsyncpa [#allocation4], 0 }
   0x3   :  { %13 = vsyncpa [#allocation4 + $0x1], 0  ;;  %s603_s12 = smov 0   ;;  %s605_s13 = smov 0  }
   0x4   :  { %s607_s14 = smov 0   ;;  %s609_s15 = smov 0  }
   0x5   :  { %s611_s16 = smov 0   ;;  %s613_s17 = smov 0  }
   0x6 LB: > { %s379_s18 = sadd.s32 4294967295, %s578_s17   ;;  %s380_s19 = sadd.s32 4294967294, %s578_s17   ;;  %s578_s17 = sphi %s613_s17, %s19_s17   ;;  %s574_s16 = sphi %s611_s16, %s800_s16   ;;  %s570_s15 = sphi %s609_s15, %s799_s15   ;;  %s566_s14 = sphi %s607_s14, %s798_s14   ;;  %s562_s13 = sphi %s605_s13, %s797_s13   ;;  %s558_s12 = sphi %s603_s12, %s796_s12  }
   0x7   : > { %s31_s20 = sadd.s32 1, %s574_s16  ;;  %s40_s21 = sadd.s32 1, %s566_s14 }
   0x8   : > { %p33_p0 = scmp.ge.s32.totalorder %s31_s20, 2  ;;  %p47_p1 = scmp.ne.s32.totalorder %s566_s14, %s562_s13 }
   0x9   : > { %p48_p2 = scmp.eq.s32.totalorder %s578_s17, 0  ;;  %p53_p3 = scmp.ne.s32.totalorder %s562_s13, %s558_s12 }
   0xa   : > { %s802_s20 = smov (%p33_p0, %s31_s20), 0  ;;  %p54_p5 = scmp.eq.s32.totalorder %s379_s18, 0 }
   0xb   : > { %p644_p4 = por %p48_p2, %p47_p1  ;;  %s35_s23 = ssub.s32 %s574_s16, %s802_s20 }
   0xc   : > { %p121_p6 = scmp.eq.s32.totalorder %s379_s18, 1  ;;  %p38_p7 = scmp.eq.s32.totalorder %s35_s23, 0 }
   0xd   : > { %p650_p8 = por %p54_p5, %p53_p3  ;;  %p127_p10 = scmp.eq.s32.totalorder %s380_s19, 1 }
   0xe   : > { %p654_p9 = por %p121_p6, %p47_p1  ;;  %p412_p13 = scmp.lt.s32.totalorder %s578_s17, 2 }
   0xf   : > { %s659_s26 = scalar_select %p38_p7, %s566_s14, %s40_s21  }
  0x10   : > { %s788_s25 = scalar_select %p654_p9, 1, 0 }
  0x11   : > { %p661_p11 = por %p127_p10, %p53_p3  ;;  %s153_s28 = sand.u32 1, %s566_s14  }
  0x12   : > { %s383_s29 = sshll.u32 %s153_s28, 3  ;;  %s398_s30 = sshll.u32 %s574_s16, 7 }
  0x13   : > { %s789_s27 = scalar_select %p661_p11, 1, 0 }
  0x14   : > { %s672_s6 = scalar_lea.hbm %s781_s0, %s398_s30  ;;  %s157_s7 = scalar_lea.vmem [#allocation2], %s383_s29 }
  0x15   : > { %s167_s8 = sshll.u32 %s157_s7, 4  ;;  %p678_p0 = pnand %p412_p13, %p644_p4  ;;  %s674_s8 = int_to_ptr.vmem [resolvable:$true] %s167_s8 }
  0x16   : > { %s154_s10 = scalar_lea.sflag [#allocation3], %s153_s28  ;;  %s466_s11 = scalar_lea.hbm %s672_s6, 128 }
  0x17   : > { %p467_p3 = scmp.ne.s32.totalorder %s672_s6, %s466_s11  ;;  %p468_p5 = pneg %p678_p0 }
  0x18   : > { %s471_s21 = scalar_lea.hbm %s781_s0, 256  ;;  %p472_p4 = scmp.lt.u32.totalorder %s672_s6, %s781_s0 }
  0x19   : > { %p469_p6 = pnand %p468_p5, %p467_p3  ;;  %p473_p10 = scmp.lt.u32.totalorder %s471_s21, %s466_s11 }
  0x1a   : > { %p475_p12 = scmp.lt.u32.totalorder %s466_s11, %s672_s6 }
  0x1b   : > { %p470_p7 = pneg %p469_p6  ;;  %p474_p13 = por %p473_p10, %p472_p4 }
  0x1d   : > { %p476_p1 = por %p475_p12, %p474_p13 }
  0x1f   : > { %p477_p2 = pnand %p476_p1, %p470_p7 }
  0x21   : > { %480 = shalt.err (!%p477_p2)
}
  0x22   : > { %s481_s28 = scalar_lea.vmem %s674_s8, 128  ;;  %s580_s29 = smov [#allocation2]  }
  0x23   : > { %p482_p3 = scmp.ne.s32.totalorder %s674_s8, %s481_s28  ;;  %s486_s30 = sshll.u32 %s580_s29, 4  ;;  %s487_s30 = int_to_ptr.vmem [resolvable:$false] %s486_s30 }
  0x24   : > { %s488_s4 = scalar_lea.vmem %s487_s30, 256  ;;  %p489_p9 = scmp.lt.s32.totalorder %s674_s8, %s487_s30 }
  0x25   : > { %p484_p6 = pnand %p482_p3, %p468_p5  ;;  %p490_p4 = scmp.lt.s32.totalorder %s488_s4, %s481_s28 }
  0x27   : > { %p485_p11 = pneg %p484_p6  ;;  %p491_p10 = por %p490_p4, %p489_p9 }
  0x29   : > { %p492_p12 = pnand %p491_p10, %p485_p11 }
  0x2b   : > { %495 = shalt.err (!%p492_p12)
}
  0x2c   : > { %407 = dma.hbm_to_vmem [thread:$0]  (!%p678_p0), %s672_s6, 128, %s674_s8, %s154_s10  }
  0x2d   : > { %p791_p1 = scmp.lt.s32.totalorder %s578_s17, 3  ;;  %p792_p2 = scmp.ge.s32.totalorder %s578_s17, 1 }
  0x2f   : > { %p173_p5 = pnand %p792_p2, %p791_p1 }
  0x30   : > { %s714_s5 = sand.u32 (!%p173_p5), 1, %s562_s13  }
  0x31   : > { %176 = sbr.rel (%p173_p5) target bundleno = 295 (0x127), region = 32  ;;  %s387_s7 = sshll.u32 (!%p173_p5), %s714_s5, 3 }
  0x32   : > { %s179_s11 = scalar_lea.sflag (!%p173_p5), [#allocation3], %s714_s5  ;;  %s182_s18 = scalar_lea.vmem (!%p173_p5), [#allocation2], %s387_s7 }
  0x38   : > { %549 = dma.done.wait (%p650_p8), %s179_s11, 128  }
  0x39   : > { %551 = vsyncadd (%p650_p8), %s179_s11, 4294967168  ;;  %v581_v0 = vmov 0   ;;  %v209_v1 = vld [vmem:[%s182_s18] sm:$0xff]  ;;  %vm225_vm0 = vcmask 1043456   ;;  %vm221_vm1 = vcmask 64512   ;;  %s399_s24 = sshll.u32 %s570_s15, 7 }
  0x3a   : > { %264 = vmatprep.mubr.bf16.mxu0 %v581_v0  ;;  %463 = vset.pattern.permute.xlu0 %v581_v0  ;;  %v210_v2 = vld [vmem:[%s783_s2] sm:$0xf]  ;;  %v390_v3 = vcombine.high %v209_v1, %v209_v1  ;;  %v389_v4 = vcombine.low %v209_v1, %v209_v1  ;;  %s204_s19 = scalar_lea.vmem [#allocation5], %s387_s7  ;;  %s732_s28 = scalar_lea.hbm %s784_s3, %s399_s24 }
  0x3b   : > { %213 = vperm.xlu0 %463, %v210_v2   ;;  %v208_v6 = vld [vmem:[%s782_s1] sm:$0x3]  ;;  %s295_s21 = sshll.u32 %s204_s19, 4  ;;  %s279_s29 = scalar_lea.sflag [#allocation4], %s714_s5  ;;  %s734_s21 = int_to_ptr.vmem [resolvable:$true] %s295_s21 }
  0x3c   : > { %391 = vmatprep.subr.msk.bf16.mxu0 %vm225_vm0, %v390_v3  ;;  %v227_v5 = vsel %vm225_vm0, %v389_v4, 0  ;;  %s496_s30 = scalar_lea.vmem %s734_s21, 128  ;;  %p793_p9 = scmp.ne.s32.totalorder %s788_s25, 0 }
  0x3d   : > { %233 = vmatpush1.bf16.msra.mxu0 %v227_v5  ;;  %p497_p8 = scmp.ne.s32.totalorder %s734_s21, %s496_s30  ;;  %s582_s15 = smov [#allocation5]  }
  0x3e   : > { %s500_s4 = sshll.u32 %s582_s15, 4  ;;  %s501_s4 = int_to_ptr.vmem [resolvable:$false] %s500_s4 }
  0x3f   : > { %p498_p11 = pnand %p497_p8, %p793_p9  ;;  %s502_s7 = scalar_lea.vmem %s501_s4, 256 }
  0x40   : > { %392 = vmatmul.mubr.msk.bf16.vlgmr.msra.gmra.mrb[0].mxu0 %vm221_vm1, %v208_v6  ;;  %p503_p7 = scmp.lt.s32.totalorder %s734_s21, %s501_s4  ;;  %p504_p13 = scmp.lt.s32.totalorder %s502_s7, %s496_s30 }
  0x41   : > { %p499_p0 = pneg %p498_p11 }
  0x42   : > { %p505_p3 = por %p504_p13, %p503_p7 }
  0x44   : > { %p506_p6 = pnand %p505_p3, %p499_p0 }
  0xba   : > { %v214_v7 = vpop.permute.xlu0 %213 }
 0x113   : > { %v266_v8 = vpop.f32.mrb[0].mxu0 }
 0x114   : > { %v267_v9 = vadd.f32 %v266_v8, %v214_v7  ;;  %v268_v10 = vpop.f32.mrb[1].mxu0 }
 0x115   : > { %v269_v11 = vadd.f32 %v268_v10, %v214_v7  ;;  %v270_v12 = vpop.f32.mrb[2].mxu0 }
 0x116   : > { %v271_v13 = vpop.f32.mrb[3].mxu0 }
 0x117   : > { %v275_v14 = vcombine.low %v267_v9, %v269_v11 }
 0x119   : > { %277 = vst [vmem:[%s204_s19] sm:$0xff] %v275_v14 }
 0x11a   : > { %509 = shalt.err (!%p506_p6)
}
 0x11b   : > { %s510_s5 = scalar_lea.hbm %s732_s28, 128  ;;  %s514_s6 = scalar_lea.hbm %s784_s3, 256 }
 0x11c   : > { %p511_p4 = scmp.ne.s32.totalorder %s732_s28, %s510_s5  ;;  %p515_p1 = scmp.lt.u32.totalorder %s732_s28, %s784_s3 }
 0x11d   : > { %p516_p2 = scmp.lt.u32.totalorder %s514_s6, %s510_s5  ;;  %p518_p8 = scmp.lt.u32.totalorder %s510_s5, %s732_s28 }
 0x11e   : > { %p512_p10 = pnand %p511_p4, %p793_p9 }
 0x11f   : > { %p517_p5 = por %p516_p2, %p515_p1 }
 0x120   : > { %p513_p12 = pneg %p512_p10 }
 0x121   : > { %p519_p11 = por %p518_p8, %p517_p5 }
 0x123   : > { %p520_p0 = pnand %p519_p11, %p513_p12 }
 0x125   : > { %523 = shalt.err (!%p520_p0)
}
 0x126   : > { %402 = dma.vmem_to_hbm [thread:$0]  (%p793_p9), %s734_s21, 128, %s732_s28, %s279_s29  }
 0x127 PF: > { %s307_s10 = sand.u32 1, %s558_s12   ;;  %p794_p7 = scmp.ne.s32.totalorder %s789_s27, 0 }
 0x128   : > { %p795_p13 = scmp.ge.s32.totalorder %s578_s17, 2  ;;  %s308_s24 = scalar_lea.sflag [#allocation4], %s307_s10 }
 0x12a   : > { %p409_p3 = pnand %p795_p13, %p794_p7 }
 0x12c   : > { %553 = dma.done.wait (!%p409_p3), %s308_s24, 128  }
 0x12d   : > { %555 = vsyncadd (!%p409_p3), %s308_s24, 4294967168  ;;  %s19_s17 = sadd.s32 1, %s578_s17   ;;  %s796_s12 = smov %s562_s13 }
 0x12e   : > { %p16_p6 = scmp.ge.s32.totalorder %s19_s17, 4   ;;  %s797_s13 = smov %s566_s14 }
 0x12f   : > { %s798_s14 = smov %s659_s26  ;;  %s799_s15 = smov %s574_s16 }
 0x130   : > { %s800_s16 = smov %s802_s20  ;;  %18 = sbr.rel (!%p16_p6) target bundleno = 6 (0x6), region = 77 }
 0x137   :  { %313 = vsyncpa [#allocation3], 1 }
 0x138   :  { %315 = vsyncpa [#allocation3 + $0x1], 1 }
 0x139   :  { %316 = vsyncpa [#allocation4], 1 }
 0x13a   :  { %318 = vsyncpa [#allocation4 + $0x1], 1 }

</bundles_post_ra>
